<compile_context>
chip_gen: v7x
topology: tpu7x:2x2x1
jax: 0.10.0
libtpu: 0.0.40
codegen_flags: <defaults>
</compile_context>

<pallas_src>
import functools

import jax
import jax.numpy as jnp
from jax.experimental import pallas as pl
from jax.experimental.pallas import tpu as pltpu


def _round_up(x, m):
    return ((x + m - 1) // m) * m


def _detect_vmem_capacity_bytes():
    """Physical VMEM per TensorCore (128 MiB on v5e/v6e, 64 MiB on v7x)."""
    try:
        cap = getattr(pltpu.get_tpu_info(), "vmem_capacity_bytes", None)
        if cap:
            return int(cap)
    except Exception:
        pass
    return 64 << 20  # conservative fallback (v7x per-TC figure)


_VMEM_CAPACITY = _detect_vmem_capacity_bytes()
# Explicit scoped-VMEM limit (default is only 16/32 MiB) with headroom for compiler scratch.
_VMEM_LIMIT = int(min(_VMEM_CAPACITY * 0.9, 120 << 20))
# Budget used to size tiles (leave headroom under the limit).
_VMEM_BUDGET = int(min(_VMEM_CAPACITY * 0.7, 96 << 20))


# --------------------------------------------------------------------------------------
# Kernels
# --------------------------------------------------------------------------------------
def _ffn_kernel_direct(x_ref, w1_ref, b1_ref, w2_ref, b2_ref, o_ref):
    # Weights are full (D, H)/(H, D) blocks with constant index_maps -> DMA'd once and
    # VMEM-resident for the whole grid. No hidden-dim reduction -> no scratch accumulator.
    h = jnp.dot(x_ref[...], w1_ref[...], preferred_element_type=jnp.float32)
    h = jnp.maximum(h + b1_ref[...].astype(jnp.float32), 0.0)
    # dropout (eval mode) == identity
    y = jnp.dot(h.astype(w2_ref.dtype), w2_ref[...], preferred_element_type=jnp.float32)
    # dropout (eval mode) == identity
    o_ref[...] = (y + b2_ref[...].astype(jnp.float32)).astype(o_ref.dtype)


def _ffn_kernel_acc(x_ref, w1_ref, b1_ref, w2_ref, b2_ref, o_ref, acc_ref):
    # Hidden-dim-tiled fallback for weight matrices too large to keep VMEM-resident.
    # x_ref : (TM, D)   w1_ref: (D, TH)   b1_ref: (1, TH)
    # w2_ref: (TH, D)   b2_ref: (1, D)    o_ref : (TM, D)   acc_ref: (TM, D) f32
    h_idx = pl.program_id(1)

    h = jnp.dot(x_ref[...], w1_ref[...], preferred_element_type=jnp.float32)
    h = jnp.maximum(h + b1_ref[...].astype(jnp.float32), 0.0)
    # dropout (eval mode) == identity
    partial = jnp.dot(h.astype(w2_ref.dtype), w2_ref[...],
                      preferred_element_type=jnp.float32)

    @pl.when(h_idx == 0)
    def _():                      # first slice writes directly: no separate zero-init pass
        acc_ref[...] = partial

    @pl.when(h_idx > 0)
    def _():
        acc_ref[...] += partial

    @pl.when(h_idx == pl.num_programs(1) - 1)
    def _():
        y = acc_ref[...] + b2_ref[...].astype(jnp.float32)
        # dropout (eval mode) == identity
        o_ref[...] = y.astype(o_ref.dtype)


# --------------------------------------------------------------------------------------
# Tile-size selection from the per-generation VMEM budget
# --------------------------------------------------------------------------------------
def _choose_tiles(m, dim, hid, x_isz, w_isz, o_isz, tm=None, th=None):
    """Pick (tm, th). th == hid means the full weight matrices stay VMEM-resident
    (single grid axis, direct kernel, no accumulator)."""
    granule = 8 if x_isz >= 4 else (16 if x_isz == 2 else 32)
    m_r = _round_up(max(m, 1), granule)

    def fits(tm_, th_, with_acc):
        wbytes = 2 * 2 * dim * th_ * w_isz           # W1 + W2 blocks, double-buffered
        xbytes = 2 * tm_ * dim * x_isz               # x tile, double-buffered
        obytes = 2 * tm_ * dim * o_isz               # out tile, double-buffered
        accb = tm_ * dim * 4 if with_acc else 0      # f32 scratch accumulator
        tmpb = tm_ * th_ * 4 + tm_ * dim * 4         # f32 intermediates (h, partial)
        return wbytes + xbytes + obytes + accb + tmpb + (2 << 20) <= _VMEM_BUDGET

    # ---- hidden-dim tile -----------------------------------------------------------
    if th is None:
        if fits(granule, hid, with_acc=False):
            th = hid                                 # full weights VMEM-resident
        else:
            th = 128
            for cand in (2048, 1024, 512, 256):      # MXU/lane-friendly multiples
                if cand < hid and fits(granule, cand, with_acc=True):
                    th = cand
                    break
    elif th >= hid or hid <= 128:
        th = hid
    else:
        th = max(128, (min(th, hid) // 128) * 128)   # keep lane-dense / MXU-friendly

    with_acc = th < hid

    # ---- row tile --------------------------------------------------------------------
    if tm is not None:
        tm = max(granule, _round_up(min(tm, m_r), granule))
        return tm, th

    tm_fit = granule
    for cand in (2048, 1024, 512, 256, 128, 64, 32, 16, 8):
        if cand >= granule and cand % granule == 0 and fits(cand, th, with_acc):
            tm_fit = cand
            break
    num_m = max(1, -(-m_r // tm_fit))                # ceil
    if not with_acc and m_r >= 2 * granule:
        num_m = max(num_m, 2)    # >=2 "parallel" row tiles so both v7x TensorCores get work
    tm = _round_up(-(-m_r // num_m), granule)        # equal split -> minimal M padding
    return tm, th


# --------------------------------------------------------------------------------------
# Wrapper
# --------------------------------------------------------------------------------------
@functools.partial(jax.jit, static_argnames=("tm", "th"))
def feed_forward(x, w1, b1, w2, b2, *, tm=None, th=None):
    """x: (..., dim). Weights stored transposed vs nn.Linear: w1 (dim, hid), w2 (hid, dim).
    Biases may be (n,) or (1, n). Returns same shape/dtype as x. Dropout == eval-mode identity."""
    orig_shape = x.shape
    dim = orig_shape[-1]
    hid = w1.shape[1]
    if b1.ndim == 1:
        b1 = b1.reshape(1, -1)
    if b2.ndim == 1:
        b2 = b2.reshape(1, -1)

    x2d = x.reshape(-1, dim)
    m = x2d.shape[0]

    tm, th = _choose_tiles(m, dim, hid, x2d.dtype.itemsize, w1.dtype.itemsize,
                           x.dtype.itemsize, tm, th)

    mp = _round_up(m, tm)
    if mp != m:
        x2d = jnp.pad(x2d, ((0, mp - m), (0, 0)))    # cheap; pad rows sliced off the output
    num_m = mp // tm

    if th >= hid:
        # ---- weights fully VMEM-resident: fetched once from HBM, no accumulator ------
        flops = 4 * mp * dim * hid
        bytes_acc = (x2d.size * x2d.dtype.itemsize
                     + (w1.size + b1.size + w2.size + b2.size) * w1.dtype.itemsize
                     + mp * dim * x.dtype.itemsize)
        out = pl.pallas_call(
            _ffn_kernel_direct,
            out_shape=jax.ShapeDtypeStruct((mp, dim), x.dtype),
            grid_spec=pltpu.PrefetchScalarGridSpec(
                num_scalar_prefetch=0,
                grid=(num_m,),
                in_specs=[
                    pl.BlockSpec((tm, dim), lambda i: (i, 0)),    # x row tile (pipelined)
                    pl.BlockSpec((dim, hid), lambda i: (0, 0)),   # W1, resident (DMA'd once)
                    pl.BlockSpec((1, hid), lambda i: (0, 0)),     # b1, resident
                    pl.BlockSpec((hid, dim), lambda i: (0, 0)),   # W2, resident (DMA'd once)
                    pl.BlockSpec((1, dim), lambda i: (0, 0)),     # b2, resident
                ],
                out_specs=pl.BlockSpec((tm, dim), lambda i: (i, 0)),
            ),
            compiler_params=pltpu.CompilerParams(
                dimension_semantics=("parallel",),
                vmem_limit_bytes=_VMEM_LIMIT,
            ),
            cost_estimate=pl.CostEstimate(flops=flops, transcendentals=0,
                                          bytes_accessed=bytes_acc),
        )(x2d, w1, b1, w2, b2)
    else:
        # ---- hidden-dim tiled fallback (weights too large to keep VMEM-resident) -----
        hp = _round_up(hid, th)
        if hp != hid:
            # Correctness fallback only: prefer prepare_params() so this per-call
            # HBM read+write of the weights never happens.
            w1 = jnp.pad(w1, ((0, 0), (0, hp - hid)))
            b1 = jnp.pad(b1, ((0, 0), (0, hp - hid)))
            w2 = jnp.pad(w2, ((0, hp - hid), (0, 0)))
        num_h = hp // th
        flops = 4 * mp * dim * hp
        bytes_acc = (x2d.size * x2d.dtype.itemsize
                     + num_m * (w1.size + b1.size + w2.size) * w1.dtype.itemsize
                     + b2.size * b2.dtype.itemsize
                     + mp * dim * x.dtype.itemsize)
        out = pl.pallas_call(
            _ffn_kernel_acc,
            out_shape=jax.ShapeDtypeStruct((mp, dim), x.dtype),
            grid_spec=pltpu.PrefetchScalarGridSpec(
                num_scalar_prefetch=0,
                grid=(num_m, num_h),
                in_specs=[
                    pl.BlockSpec((tm, dim), lambda i, h: (i, 0)),   # x row tile
                    pl.BlockSpec((dim, th), lambda i, h: (0, h)),   # W1 hidden slice
                    pl.BlockSpec((1, th), lambda i, h: (0, h)),     # b1 hidden slice
                    pl.BlockSpec((th, dim), lambda i, h: (h, 0)),   # W2 hidden slice
                    pl.BlockSpec((1, dim), lambda i, h: (0, 0)),    # b2 (resident)
                ],
                out_specs=pl.BlockSpec((tm, dim), lambda i, h: (i, 0)),
                scratch_shapes=[pltpu.VMEM((tm, dim), jnp.float32)],
            ),
            compiler_params=pltpu.CompilerParams(
                dimension_semantics=("parallel", "arbitrary"),
                vmem_limit_bytes=_VMEM_LIMIT,
            ),
            cost_estimate=pl.CostEstimate(flops=flops, transcendentals=0,
                                          bytes_accessed=bytes_acc),
        )(x2d, w1, b1, w2, b2)

    if mp != m:
        out = out[:m]
    return out.reshape(orig_shape)


# --------------------------------------------------------------------------------------
# Parameter helpers
# --------------------------------------------------------------------------------------
def init_params(key, dim, hid_dim, dtype=jnp.float32):
    """Deterministic init mimicking nn.Linear shapes (weights stored transposed)."""
    k1, k2, k3, k4 = jax.random.split(key, 4)
    bound1 = 1.0 / (dim ** 0.5)
    bound2 = 1.0 / (hid_dim ** 0.5)
    # nn.Linear(dim, hid_dim): weight (hid_dim, dim) -> store as (dim, hid_dim)
    w1 = jax.random.uniform(k1, (dim, hid_dim), dtype, -bound1, bound1)
    b1 = jax.random.uniform(k2, (hid_dim,), dtype, -bound1, bound1)
    # nn.Linear(hid_dim, dim): weight (dim, hid_dim) -> store as (hid_dim, dim)
    w2 = jax.random.uniform(k3, (hid_dim, dim), dtype, -bound2, bound2)
    b2 = jax.random.uniform(k4, (dim,), dtype, -bound2, bound2)
    return w1, b1, w2, b2


def prepare_params(w1, b1, w2, b2, *, hid_multiple=256):
    """One-time setup: normalize biases to (1, n) and zero-pad the hidden dim to a multiple
    of `hid_multiple` (MXU-friendly; keeps all weight padding out of the per-call path).
    Padding is exact: padded hidden units have zero W1 columns / b1 entries / W2 rows."""
    b1 = jnp.asarray(b1).reshape(1, -1)
    b2 = jnp.asarray(b2).reshape(1, -1)
    hid = w1.shape[1]
    hp = _round_up(hid, hid_multiple)
    if hp != hid:
        w1 = jnp.pad(w1, ((0, 0), (0, hp - hid)))
        b1 = jnp.pad(b1, ((0, 0), (0, hp - hid)))
        w2 = jnp.pad(w2, ((0, hp - hid), (0, 0)))
    return w1, b1, w2, b2


def _reference(x, w1, b1, w2, b2):
    dim = x.shape[-1]
    x2d = x.reshape(-1, dim).astype(jnp.float32)
    h = jnp.maximum(x2d @ w1.astype(jnp.float32)
                    + b1.reshape(1, -1).astype(jnp.float32), 0.0)
    y = h @ w2.astype(jnp.float32) + b2.reshape(1, -1).astype(jnp.float32)
    return y.reshape(x.shape)


if __name__ == "__main__":
    key = jax.random.PRNGKey(0)
    dp_rate = 0.1  # eval mode -> dropout is identity

    # ---- test 1: small shapes, resident-weight (direct) path, f32 ----------------------
    batch, seq, dim, hid_dim = 2, 8, 32, 64
    kx, kp, kx2, kp2 = jax.random.split(key, 4)
    x = jax.random.normal(kx, (batch, seq, dim), jnp.float32)
    params = init_params(kp, dim, hid_dim)

    out = jax.block_until_ready(feed_forward(x, *params))
    ref = _reference(x, *params)
    assert out.shape == x.shape
    assert jnp.allclose(out, ref, atol=1e-5, rtol=1e-5)

    # ---- test 2: odd shapes -> M padding + hidden-dim tiling + accumulator path --------
    b2_, s2_, d2_, h2_ = 3, 7, 128, 192      # m=21, hid=192
    x_t = jax.random.normal(kx2, (b2_, s2_, d2_), jnp.float32)
    p_t = init_params(kp2, d2_, h2_)
    out_t = jax.block_until_ready(feed_forward(x_t, *p_t, tm=16, th=128))  # force acc path
    ref_t = _reference(x_t, *p_t)
    assert out_t.shape == x_t.shape
    assert jnp.allclose(out_t, ref_t, atol=1e-4, rtol=1e-4)

    # ---- test 3: prepare_params (setup-time hidden padding) + auto tiling --------------
    p_prep = prepare_params(*p_t, hid_multiple=256)
    out_p = jax.block_until_ready(feed_forward(x_t, *p_prep))
    assert out_p.shape == x_t.shape
    assert jnp.allclose(out_p, ref_t, atol=1e-4, rtol=1e-4)

    # ---- test 4: bf16 inputs/weights (MXU fast path), loose tolerance ------------------
    x_bf = x.astype(jnp.bfloat16)
    pb = tuple(p.astype(jnp.bfloat16) for p in params)
    out_bf = jax.block_until_ready(feed_forward(x_bf, *pb))
    assert out_bf.shape == x.shape and out_bf.dtype == jnp.bfloat16
    assert jnp.allclose(out_bf.astype(jnp.float32), ref, atol=5e-2, rtol=5e-2)

    print("KERNEL_OK")
</pallas_src>

<mosaic_0001>
module attributes {stable_mosaic.version = 11 : i64} {
  func.func @_ffn_kernel_direct(%arg0: i32, %arg1: memref<8x32xf32, #tpu.memory_space<vmem>>, %arg2: memref<32x64xf32, #tpu.memory_space<vmem>>, %arg3: memref<1x64xf32, #tpu.memory_space<vmem>>, %arg4: memref<64x32xf32, #tpu.memory_space<vmem>>, %arg5: memref<1x32xf32, #tpu.memory_space<vmem>>, %arg6: memref<8x32xf32, #tpu.memory_space<vmem>>) attributes {dimension_semantics = [#tpu.dimension_semantics<parallel>], iteration_bounds = array<i64: 2>, scalar_prefetch = 0 : i64, scratch_operands = 0 : i64, tpu.core_type = #tpu.core_type<tc>, window_params = [{transform_indices = @transform_0, window_bounds = array<i64: 8, 32>}, {pipeline_mode = #tpu.pipeline_mode<synchronous>, transform_indices = @transform_1, window_bounds = array<i64: 32, 64>}, {pipeline_mode = #tpu.pipeline_mode<synchronous>, transform_indices = @transform_2, window_bounds = array<i64: 1, 64>}, {pipeline_mode = #tpu.pipeline_mode<synchronous>, transform_indices = @transform_3, window_bounds = array<i64: 64, 32>}, {pipeline_mode = #tpu.pipeline_mode<synchronous>, transform_indices = @transform_4, window_bounds = array<i64: 1, 32>}, {transform_indices = @transform_5, window_bounds = array<i64: 8, 32>}]} {
    %c0 = arith.constant 0 : index
    %c0_0 = arith.constant 0 : index
    %0 = vector.load %arg1[%c0, %c0_0] : memref<8x32xf32, #tpu.memory_space<vmem>>, vector<8x32xf32>
    %c0_1 = arith.constant 0 : index
    %c0_2 = arith.constant 0 : index
    %1 = vector.load %arg2[%c0_1, %c0_2] : memref<32x64xf32, #tpu.memory_space<vmem>>, vector<32x64xf32>
    %cst = arith.constant dense<0.000000e+00> : vector<8x64xf32>
    %2 = tpu.matmul %0, %1, %cst {dimension_numbers = #tpu.dot_dimension_numbers<[1], [0], [0], [1], [0, 0, 1, 1], [], []>} : vector<8x32xf32>, vector<32x64xf32>, vector<8x64xf32> -> vector<8x64xf32>
    %c0_3 = arith.constant 0 : index
    %c0_4 = arith.constant 0 : index
    %3 = vector.load %arg3[%c0_3, %c0_4] : memref<1x64xf32, #tpu.memory_space<vmem>>, vector<1x64xf32>
    %4 = vector.broadcast %3 : vector<1x64xf32> to vector<8x64xf32>
    %5 = arith.addf %2, %4 : vector<8x64xf32>
    %cst_5 = arith.constant 0.000000e+00 : f32
    %6 = vector.broadcast %cst_5 : f32 to vector<8x64xf32>
    %7 = arith.maximumf %5, %6 : vector<8x64xf32>
    %c0_6 = arith.constant 0 : index
    %c0_7 = arith.constant 0 : index
    %8 = vector.load %arg4[%c0_6, %c0_7] : memref<64x32xf32, #tpu.memory_space<vmem>>, vector<64x32xf32>
    %cst_8 = arith.constant dense<0.000000e+00> : vector<8x32xf32>
    %9 = tpu.matmul %7, %8, %cst_8 {dimension_numbers = #tpu.dot_dimension_numbers<[1], [0], [0], [1], [0, 0, 1, 1], [], []>} : vector<8x64xf32>, vector<64x32xf32>, vector<8x32xf32> -> vector<8x32xf32>
    %c0_9 = arith.constant 0 : index
    %c0_10 = arith.constant 0 : index
    %10 = vector.load %arg5[%c0_9, %c0_10] : memref<1x32xf32, #tpu.memory_space<vmem>>, vector<1x32xf32>
    %11 = vector.broadcast %10 : vector<1x32xf32> to vector<8x32xf32>
    %12 = arith.addf %9, %11 : vector<8x32xf32>
    %c0_11 = arith.constant 0 : index
    %c0_12 = arith.constant 0 : index
    %13 = vector.load %arg6[%c0_11, %c0_12] : memref<8x32xf32, #tpu.memory_space<vmem>>, vector<8x32xf32>
    tpu.vector_store %arg6[%c0_11, %c0_12], %12 {strides = array<i32>} : memref<8x32xf32, #tpu.memory_space<vmem>>, vector<8x32xf32>,
    return
  }
  func.func @transform_0(%arg0: i32) -> (i32, i32) {
    %c0_i32 = arith.constant 0 : i32
    %c0_i32_0 = arith.constant 0 : i32
    return %arg0, %c0_i32 : i32, i32
  }
  func.func @transform_1(%arg0: i32) -> (i32, i32) {
    %c0_i32 = arith.constant 0 : i32
    %c0_i32_0 = arith.constant 0 : i32
    %c0_i32_1 = arith.constant 0 : i32
    return %c0_i32, %c0_i32_0 : i32, i32
  }
  func.func @transform_2(%arg0: i32) -> (i32, i32) {
    %c0_i32 = arith.constant 0 : i32
    %c0_i32_0 = arith.constant 0 : i32
    %c0_i32_1 = arith.constant 0 : i32
    return %c0_i32, %c0_i32_0 : i32, i32
  }
  func.func @transform_3(%arg0: i32) -> (i32, i32) {
    %c0_i32 = arith.constant 0 : i32
    %c0_i32_0 = arith.constant 0 : i32
    %c0_i32_1 = arith.constant 0 : i32
    return %c0_i32, %c0_i32_0 : i32, i32
  }
  func.func @transform_4(%arg0: i32) -> (i32, i32) {
    %c0_i32 = arith.constant 0 : i32
    %c0_i32_0 = arith.constant 0 : i32
    %c0_i32_1 = arith.constant 0 : i32
    return %c0_i32, %c0_i32_0 : i32, i32
  }
  func.func @transform_5(%arg0: i32) -> (i32, i32) {
    %c0_i32 = arith.constant 0 : i32
    %c0_i32_0 = arith.constant 0 : i32
    return %arg0, %c0_i32 : i32, i32
  }
}

</mosaic_0001>

<bundles_post_ra>
// kernel: feed_forward.1
= control target key start
LH: loop header
LB: loop body
LE: loop exit
PB: predicated region body
PF: predicated region fallthrough
CT: control target
= control target key end

     0   :  { %10 = vsyncpa [#allocation3], 0  ;;  %s830_s0 = inlined_call_operand.vmem [shape: f32[16,32], index: 0, kind: input, shape index: {}]   ;;  %s831_s1 = inlined_call_operand.vmem [shape: f32[32,64], index: 1, kind: input, shape index: {}]   ;;  %s832_s2 = inlined_call_operand.vmem [shape: f32[1,64], index: 2, kind: input, shape index: {}]   ;;  %s833_s3 = inlined_call_operand.vmem [shape: f32[64,32], index: 3, kind: input, shape index: {}]   ;;  %s834_s4 = inlined_call_operand.vmem [shape: f32[1,32], index: 4, kind: input, shape index: {}]   ;;  %s835_s5 = inlined_call_operand.hbm [shape: f32[16,32], index: 5, kind: output, shape index: {}]  }
   0x1   :  { %12 = vsyncpa [#allocation3 + $0x1], 0  ;;  %s686_s18 = smov 0   ;;  %s688_s19 = smov 0  }
   0x2   :  { %s690_s20 = smov 0   ;;  %s692_s21 = smov 0  }
   0x3 LB: > { %s707_s22 = sadd.s32 4294967295, %s650_s21   ;;  %s470_s23 = sadd.s32 4294967294, %s650_s21   ;;  %s650_s21 = sphi %s692_s21, %s841_s21   ;;  %s646_s20 = sphi %s690_s20, %s840_s20   ;;  %s642_s19 = sphi %s688_s19, %s839_s19   ;;  %s638_s18 = sphi %s686_s18, %s838_s18  }
   0x4   : > { %s711_s24 = sadd.s32 1, %s650_s21   ;;  %s135_s25 = sadd.s32 1, %s646_s20 }
   0x5   : > { %s132_s26 = ssub.s32 %s650_s21, %s711_s24  ;;  %p145_p0 = scmp.ne.s32.totalorder %s646_s20, %s642_s19 }
   0x6   : > { %p133_p1 = scmp.eq.s32.totalorder %s132_s26, 0  ;;  %p146_p2 = scmp.eq.s32.totalorder %s707_s22, 1 }
   0x7   : > { %p151_p3 = scmp.ne.s32.totalorder %s642_s19, %s638_s18  ;;  %p152_p4 = scmp.eq.s32.totalorder %s470_s23, 1 }
   0x8   : > { %s722_s27 = scalar_select %p133_p1, %s646_s20, %s135_s25  }
   0x9   : > { %p724_p5 = por %p146_p2, %p145_p0  ;;  %p728_p6 = por %p152_p4, %p151_p3 }
   0xa   : > { %p473_p7 = scmp.ge.s32.totalorder %s650_s21, 1  ;;  %p189_p8 = scmp.lt.s32.totalorder %s650_s21, 3 }
   0xc   : > { %p190_p9 = pnand %p473_p7, %p189_p8 }
   0xd   : > { %v221_v0 = vld [vmem:[%s831_s1] sm:$0xff] (!%p190_p9)  ;;  %v222_v1 = vld [vmem:[%s831_s1 + $0x8] sm:$0xff] (!%p190_p9)  ;;  %v223_v2 = vld [vmem:[%s831_s1 + $0x10] sm:$0xff] (!%p190_p9)  ;;  %v652_v3 = vmov (!%p190_p9), 0.0|0.0   ;;  %vm653_vm0 = vmmov (!%p190_p9), 0   ;;  %v654_v6 = vmov (!%p190_p9), 0.0  }
   0xe   : > { %193 = sbr.rel (%p190_p9) target bundleno = 470 (0x1d6), region = 40  ;;  %528 = vmatprep.subr.bf16.mxu0 (!%p190_p9), %v652_v3  ;;  %v529_v4 = vpack.c.bf16 (!%p190_p9), %v222_v1, %v221_v0  ;;  %v224_v5 = vld [vmem:[%s831_s1 + $0x18] sm:$0xff] (!%p190_p9)  ;;  %506 = vmatprep.mubr.msk.f32.mxu0 (!%p190_p9), %vm653_vm0, %v654_v6  ;;  %p216_p10 = scmp.lt.s32.totalorder (!%p190_p9), %s707_s22, 1  ;;  %v307_v7 = vld [vmem:[%s833_s3] sm:$0xff] (!%p190_p9)  ;;  %v308_v8 = vld [vmem:[%s833_s3 + $0x8] sm:$0xff] (!%p190_p9)  ;;  %vm232_vm1 = vcmask (!%p190_p9), 261120  }
   0xf   : > { %534 = vmatprep.subr.bf16.mxu1 (!%p190_p9), %v652_v3  ;;  %v535_v9 = vpack.c.bf16 (!%p190_p9), %v308_v8, %v307_v7  ;;  %v309_v10 = vld [vmem:[%s833_s3 + $0x10] sm:$0xff] (!%p190_p9)  ;;  %v310_v11 = vld [vmem:[%s833_s3 + $0x18] sm:$0xff] (!%p190_p9)  ;;  %525 = vmatprep.mubr.msk.f32.mxu1 (!%p190_p9), %vm653_vm0, %v654_v6  ;;  %v532_v12 = vpack.c.bf16 (!%p190_p9), %v224_v5, %v223_v2  ;;  %v311_v14 = vld [vmem:[%s833_s3 + $0x20] sm:$0xff] (!%p190_p9)  ;;  %vm322_vm2 = vcmask (!%p190_p9), 523264   ;;  %s213_s26 = sand.u32 (!%p190_p9), 1, %s642_s19   ;;  %s481_s8 = sshll.u32 (!%p190_p9), %s707_s22, 7 }
  0x10   : > { %530 = vmatpush3.bf16.msra.mxu0 (!%p190_p9), %v529_v4  ;;  %v538_v13 = vpack.c.bf16 (!%p190_p9), %v310_v11, %v309_v10  ;;  %v312_v15 = vld [vmem:[%s833_s3 + $0x28] sm:$0xff] (!%p190_p9)  ;;  %v313_v18 = vld [vmem:[%s833_s3 + $0x30] sm:$0xff] (!%p190_p9)  ;;  %v314_v19 = vld [vmem:[%s833_s3 + $0x38] sm:$0xff] (!%p190_p9)  ;;  %s398_s14 = scalar_lea.sflag (!%p190_p9), [#allocation3], %s213_s26 }
  0x11   : > { %531 = vmatprep.subr.bf16.mxu0 (!%p190_p9), %v652_v3  ;;  %536 = vmatpush3.bf16.msra.mxu1 (!%p190_p9), %v535_v9  ;;  %v541_v17 = vpack.c.bf16 (!%p190_p9), %v312_v15, %v311_v14  ;;  %v544_v20 = vpack.c.bf16 (!%p190_p9), %v314_v19, %v313_v18  ;;  %v476_v21 = vld [vmem:[%s832_s2] ss:$0 sm:$0xff] (!%p190_p9) }
  0x12   : > { %537 = vmatprep.subr.bf16.mxu1 (!%p190_p9), %v652_v3  ;;  %v478_v26 = vld [vmem:[%s834_s4] ss:$0 sm:$0xff] (!%p190_p9) }
  0x14   : > { %533 = vmatpush3.bf16.msra.mxu0 (!%p190_p9), %v532_v12 }
  0x15   : > { %s217_s30 = scalar_select %p216_p10, %s707_s22, 1  ;;  %539 = vmatpush3.bf16.msra.mxu1 %v538_v13 }
  0x16   : > { %540 = vmatprep.subr.bf16.mxu1 %v652_v3  ;;  %s655_s22 = smov [#allocation2]  }
  0x17   : > { %s475_s6 = sshll.u32 %s217_s30, 3  ;;  %s474_s30 = sshll.u32 %s213_s26, 3 }
  0x18   : > { %s219_s13 = scalar_lea.vmem %s830_s0, %s475_s6  ;;  %s215_s9 = scalar_lea.vmem [#allocation2], %s474_s30 }
  0x19   : > { %v220_v16 = vld [vmem:[%s219_s13] sm:$0xff]  ;;  %542 = vmatpush3.bf16.msra.mxu1 %v541_v17  ;;  %s411_s10 = sshll.u32 %s215_s9, 4  ;;  %s787_s13 = scalar_lea.hbm %s835_s5, %s481_s8  ;;  %s789_s10 = int_to_ptr.vmem [resolvable:$true] %s411_s10 }
  0x1a   : > { %507 = vmatmul.mubr.msk.f32.vlgmr.msra.gmra.mrb[0].mxu0 %vm232_vm1, %v220_v16  ;;  %543 = vmatprep.subr.bf16.mxu1 %v652_v3  ;;  %s588_s15 = scalar_lea.vmem %s789_s10, 128  ;;  %s592_s16 = sshll.u32 %s655_s22, 4  ;;  %s593_s16 = int_to_ptr.vmem [resolvable:$false] %s592_s16 }
  0x1b   : > { %p589_p11 = scmp.ne.s32.totalorder %s789_s10, %s588_s15  ;;  %s594_s17 = scalar_lea.vmem %s593_s16, 256 }
  0x1c   : > { %p595_p0 = scmp.lt.s32.totalorder %s789_s10, %s593_s16  ;;  %p596_p1 = scmp.lt.s32.totalorder %s594_s17, %s588_s15 }
  0x1d   : > { %545 = vmatpush3.bf16.msra.mxu1 %v544_v20  ;;  %p590_p12 = pnand %p589_p11, %p724_p5 }
  0x1e   : > { %p597_p2 = por %p596_p1, %p595_p0 }
  0x1f   : > { %p591_p13 = pneg %p590_p12 }
  0x21   : > { %p598_p3 = pnand %p597_p2, %p591_p13 }
  0xed   : > { %v302_v22 = vpop.f32.mrb[0].mxu0 }
  0xee   : > { %v303_v23 = vadd.f32 %v476_v21, %v302_v22  ;;  %v508_v24 = vpop.f32.mrb[1].mxu0 }
  0xf0   : > { %v306_v25 = vmax.f32 %v303_v23, 0.0 }
  0xf2   : > { %526 = vmatmul.mubr.msk.f32.vlgmr.msra.gmra.mrb[0].mxu1 %vm322_vm2, %v306_v25 }
 0x1c5   : > { %v392_v27 = vpop.f32.mrb[0].mxu1 }
 0x1c6   : > { %v393_v28 = vadd.f32 %v478_v26, %v392_v27  ;;  %v527_v29 = vpop.f32.mrb[1].mxu1 }
 0x1c8   : > { %396 = vst.msk [vmem:[%s215_s9] sm:$0xff] %vm232_vm1, %v393_v28 }
 0x1c9   : > { %601 = shalt.err (!%p598_p3)
}
 0x1ca   : > { %s602_s23 = scalar_lea.hbm %s787_s13, 128  ;;  %s606_s30 = scalar_lea.hbm %s835_s5, 256 }
 0x1cb   : > { %p603_p4 = scmp.ne.s32.totalorder %s787_s13, %s602_s23  ;;  %p607_p9 = scmp.lt.u32.totalorder %s787_s13, %s835_s5 }
 0x1cc   : > { %p608_p10 = scmp.lt.u32.totalorder %s606_s30, %s602_s23  ;;  %p610_p12 = scmp.lt.u32.totalorder %s602_s23, %s787_s13 }
 0x1cd   : > { %p604_p7 = pnand %p603_p4, %p724_p5 }
 0x1ce   : > { %p609_p11 = por %p608_p10, %p607_p9 }
 0x1cf   : > { %p605_p8 = pneg %p604_p7 }
 0x1d0   : > { %p611_p13 = por %p610_p12, %p609_p11 }
 0x1d2   : > { %p612_p0 = pnand %p611_p13, %p605_p8 }
 0x1d4   : > { %615 = shalt.err (!%p612_p0)
}
 0x1d5   : > { %546 = dma.vmem_to_hbm [thread:$0]  (%p724_p5), %s789_s10, 128, %s787_s13, %s398_s14  }
 0x1d6 PF: > { %p552_p1 = scmp.ge.s32.totalorder %s650_s21, 2  ;;  %s423_s8 = sand.u32 1, %s638_s18  }
 0x1d7   : > { %s424_s9 = scalar_lea.sflag [#allocation3], %s423_s8 }
 0x1d8   : > { %p549_p2 = pnand %p552_p1, %p728_p6 }
 0x1da   : > { %633 = dma.done.wait (!%p549_p2), %s424_s9, 128  }
 0x1db   : > { %635 = vsyncadd (!%p549_p2), %s424_s9, 4294967168  ;;  %p15_p3 = scmp.ge.s32.totalorder %s711_s24, 4   ;;  %s838_s18 = smov %s642_s19 }
 0x1dc   : > { %s839_s19 = smov %s646_s20  ;;  %s840_s20 = smov %s722_s27 }
 0x1dd   : > { %s841_s21 = smov %s711_s24  ;;  %17 = sbr.rel (!%p15_p3) target bundleno = 3 (0x3), region = 75 }
 0x1e4   :  { %429 = vsyncpa [#allocation3], 1 }
 0x1e5   :  { %431 = vsyncpa [#allocation3 + $0x1], 1 }

</bundles_post_ra>
